<compile_context>
chip_gen: v7x
topology: tpu7x:2x2x1
jax: 0.10.0
libtpu: 0.0.40
codegen_flags: <defaults>
</compile_context>

<pallas_src>
import jax
import jax.numpy as jnp
from jax.experimental import pallas as pl
from jax.experimental.pallas import tpu as pltpu


def _ceil_to(a, m):
    return ((a + m - 1) // m) * m


# Per-generation VMEM capacity (v5e/v6e: 128 MiB, v7x: 64 MiB per TC), queried
# once at import time; leave headroom for compiler-internal scratch/semaphores.
try:
    _VMEM_CAPACITY = int(pltpu.get_tpu_info().vmem_capacity_bytes)
except Exception:
    _VMEM_CAPACITY = 64 << 20
_VMEM_LIMIT_CAP = (_VMEM_CAPACITY * 3) // 4


def highway_kernel(x_ref, w_ref, b_ref, o_ref):
    x = x_ref[...]                          # residual path: original dtype, untouched
    x_mm = x.astype(w_ref.dtype)            # matmul copy (bf16 by default)

    # One fused linear: (tile_m, D) @ (D, 2D) -> (tile_m, 2D), f32 accumulation.
    z = jnp.dot(x_mm, w_ref[...], preferred_element_type=jnp.float32)
    z = z + b_ref[...]                      # (1, 2D) f32 bias broadcast

    d = o_ref.shape[-1]                     # D is a multiple of 128 -> free vreg split
    proj = jnp.maximum(z[:, :d], 0.0)       # ReLU branch
    gate = jax.nn.sigmoid(z[:, d:])         # sigmoid branch (EUP)

    xf = x.astype(jnp.float32)
    # gate*proj + (1-gate)*x  ==  x + gate*(proj - x)   (one fewer VPU multiply)
    o_ref[...] = (xf + gate * (proj - xf)).astype(o_ref.dtype)


def prepare_highway_params(w_proj, b_proj, w_gate, b_gate,
                           matmul_dtype=jnp.bfloat16):
    """One-time parameter fusion (call at setup, NOT per forward pass).

    w_*: (D, D) in PyTorch Linear layout, b_*: (D,).
    Returns (w_fused, b_fused): w_fused is (D, 2D) pre-transposed with
    [:, :D] -> proj and [:, D:] -> gate; b_fused is (1, 2D) f32.
    """
    D = w_proj.shape[0]
    w_fused = jnp.concatenate([w_proj.T, w_gate.T], axis=1)
    if matmul_dtype is not None:
        w_fused = w_fused.astype(matmul_dtype)
    b_fused = jnp.concatenate([b_proj, b_gate]).reshape(1, 2 * D).astype(jnp.float32)
    return w_fused, b_fused


def _choose_tile_m(B, tile_m_max):
    B8 = _ceil_to(max(B, 1), 8)
    n_tiles = -(-B8 // tile_m_max)
    # Keep >= 2 grid steps when there is enough work so ("parallel",) can
    # shard the batch grid across both v7x TensorCores.
    if n_tiles == 1 and B8 >= 512:
        n_tiles = 2
    if n_tiles == 1:
        return B          # single block equal to the full batch dim (always legal)
    return _ceil_to(-(-B8 // n_tiles), 8)


def highway_pallas(x, w_fused, b_fused, *, tile_m_max=2048):
    """x: (B, D).  w_fused/b_fused from prepare_highway_params (done once)."""
    B, D = x.shape
    assert w_fused.shape == (D, 2 * D) and b_fused.shape == (1, 2 * D)
    if D % 128 != 0:
        # TODO(synk): support non-128-aligned D (pad K / split at a vreg
        # boundary); also add a K-grid axis + f32 accumulator for very large D
        # where the resident (D, 2D) weight no longer fits v7x's 64 MiB VMEM.
        raise ValueError(f"highway_pallas requires D % 128 == 0, got D={D}")

    tile_m = _choose_tile_m(B, tile_m_max)
    n_tiles = pl.cdiv(B, tile_m)

    # VMEM budget: resident fused weight+bias (double-buffer allocation),
    # double-buffered x/out tiles, and the (tile_m, 2D) f32 intermediates.
    x_item = jnp.dtype(x.dtype).itemsize
    w_bytes = w_fused.size * jnp.dtype(w_fused.dtype).itemsize
    b_bytes = b_fused.size * 4
    io_bytes = 2 * 2 * tile_m * D * x_item
    f32_tmp = 3 * tile_m * (2 * D) * 4
    needed = 2 * (w_bytes + b_bytes) + io_bytes + f32_tmp + (4 << 20)
    vmem_limit = int(min(max(needed, 32 << 20), _VMEM_LIMIT_CAP))

    grid_spec = pltpu.PrefetchScalarGridSpec(
        num_scalar_prefetch=0,
        grid=(n_tiles,),
        in_specs=[
            pl.BlockSpec((tile_m, D), lambda i: (i, 0)),      # x tile
            pl.BlockSpec((D, 2 * D), lambda i: (0, 0)),       # fused W^T (resident)
            pl.BlockSpec((1, 2 * D), lambda i: (0, 0)),       # fused bias (resident)
        ],
        out_specs=pl.BlockSpec((tile_m, D), lambda i: (i, 0)),
    )
    return pl.pallas_call(
        highway_kernel,
        out_shape=jax.ShapeDtypeStruct((B, D), x.dtype),
        grid_spec=grid_spec,
        compiler_params=pltpu.CompilerParams(
            dimension_semantics=("parallel",),
            vmem_limit_bytes=vmem_limit,
        ),
    )(x, w_fused, b_fused)


def highway_ref(x, w_proj, b_proj, w_gate, b_gate):
    proj = jax.nn.relu(x @ w_proj.T + b_proj)
    gate = jax.nn.sigmoid(x @ w_gate.T + b_gate)
    return gate * proj + (1.0 - gate) * x


if __name__ == "__main__":
    word_count = 128     # D (must be a multiple of 128)
    batch = 20           # deliberately NOT a multiple of 8

    key = jax.random.PRNGKey(0)
    kx, kwp, kbp, kwg, kbg = jax.random.split(key, 5)

    x = jax.random.normal(kx, (batch, word_count), dtype=jnp.float32)
    # Deterministic synthetic parameters (not a checkpoint load).
    w_proj = jax.random.normal(kwp, (word_count, word_count), jnp.float32) * 0.05
    b_proj = jax.random.normal(kbp, (word_count,), jnp.float32) * 0.05
    w_gate = jax.random.normal(kwg, (word_count, word_count), jnp.float32) * 0.05
    b_gate = jax.random.normal(kbg, (word_count,), jnp.float32) * 0.05

    ref = highway_ref(x, w_proj, b_proj, w_gate, b_gate)

    # Exact-f32 matmul path: verifies the forward semantics tightly.
    w_f32, b_f = prepare_highway_params(w_proj, b_proj, w_gate, b_gate,
                                        matmul_dtype=jnp.float32)
    out_f32 = jax.block_until_ready(highway_pallas(x, w_f32, b_f))
    assert out_f32.shape == (batch, word_count)
    assert jnp.allclose(out_f32, ref, atol=1e-5, rtol=1e-5), "f32 mismatch vs reference"

    # Default bf16-matmul path (f32 accumulation/combine) — looser tolerance.
    w_bf16, b_bf = prepare_highway_params(w_proj, b_proj, w_gate, b_gate)
    highway_jit = jax.jit(highway_pallas)
    out_bf16 = jax.block_until_ready(highway_jit(x, w_bf16, b_bf))
    assert jnp.allclose(out_bf16, ref, atol=2e-2, rtol=2e-2), "bf16 mismatch vs reference"

    # Multi-tile path: grid > 1 with a masked partial trailing block (no padding).
    out_mt = jax.block_until_ready(highway_pallas(x, w_bf16, b_bf, tile_m_max=8))
    assert jnp.allclose(out_mt, ref, atol=2e-2, rtol=2e-2), "multi-tile mismatch"

    print("KERNEL_OK")
</pallas_src>

<mosaic_0001>
module attributes {stable_mosaic.version = 11 : i64} {
  func.func @highway_kernel(%arg0: i32, %arg1: memref<20x128xf32, #tpu.memory_space<vmem>>, %arg2: memref<128x256xf32, #tpu.memory_space<vmem>>, %arg3: memref<1x256xf32, #tpu.memory_space<vmem>>, %arg4: memref<20x128xf32, #tpu.memory_space<vmem>>) attributes {dimension_semantics = [#tpu.dimension_semantics<parallel>], iteration_bounds = array<i64: 1>, scalar_prefetch = 0 : i64, scratch_operands = 0 : i64, tpu.core_type = #tpu.core_type<tc>, window_params = [{transform_indices = @transform_0, window_bounds = array<i64: 20, 128>}, {pipeline_mode = #tpu.pipeline_mode<synchronous>, transform_indices = @transform_1, window_bounds = array<i64: 128, 256>}, {pipeline_mode = #tpu.pipeline_mode<synchronous>, transform_indices = @transform_2, window_bounds = array<i64: 1, 256>}, {transform_indices = @transform_3, window_bounds = array<i64: 20, 128>}]} {
    %c0 = arith.constant 0 : index
    %c0_0 = arith.constant 0 : index
    %0 = vector.load %arg1[%c0, %c0_0] : memref<20x128xf32, #tpu.memory_space<vmem>>, vector<20x128xf32>
    %c0_1 = arith.constant 0 : index
    %c0_2 = arith.constant 0 : index
    %1 = vector.load %arg2[%c0_1, %c0_2] : memref<128x256xf32, #tpu.memory_space<vmem>>, vector<128x256xf32>
    %cst = arith.constant dense<0.000000e+00> : vector<20x256xf32>
    %2 = tpu.matmul %0, %1, %cst {dimension_numbers = #tpu.dot_dimension_numbers<[1], [0], [0], [1], [0, 0, 1, 1], [], []>} : vector<20x128xf32>, vector<128x256xf32>, vector<20x256xf32> -> vector<20x256xf32>
    %c0_3 = arith.constant 0 : index
    %c0_4 = arith.constant 0 : index
    %3 = vector.load %arg3[%c0_3, %c0_4] : memref<1x256xf32, #tpu.memory_space<vmem>>, vector<1x256xf32>
    %4 = vector.broadcast %3 : vector<1x256xf32> to vector<20x256xf32>
    %5 = arith.addf %2, %4 : vector<20x256xf32>
    %6 = vector.extract_strided_slice %5 {offsets = [0, 0], sizes = [20, 128], strides = [1, 1]} : vector<20x256xf32> to vector<20x128xf32>
    %cst_5 = arith.constant 0.000000e+00 : f32
    %7 = vector.broadcast %cst_5 : f32 to vector<20x128xf32>
    %8 = arith.maximumf %6, %7 : vector<20x128xf32>
    %9 = vector.extract_strided_slice %5 {offsets = [0, 128], sizes = [20, 128], strides = [1, 1]} : vector<20x256xf32> to vector<20x128xf32>
    %10 = arith.negf %9 : vector<20x128xf32>
    %11 = math.exp %10 : vector<20x128xf32>
    %cst_6 = arith.constant 1.000000e+00 : f32
    %12 = vector.broadcast %cst_6 : f32 to vector<20x128xf32>
    %13 = arith.addf %12, %11 : vector<20x128xf32>
    %14 = arith.divf %12, %13 : vector<20x128xf32>
    %15 = arith.subf %8, %0 : vector<20x128xf32>
    %16 = arith.mulf %14, %15 : vector<20x128xf32>
    %17 = arith.addf %0, %16 : vector<20x128xf32>
    %c0_7 = arith.constant 0 : index
    %c0_8 = arith.constant 0 : index
    %18 = vector.load %arg4[%c0_7, %c0_8] : memref<20x128xf32, #tpu.memory_space<vmem>>, vector<20x128xf32>
    tpu.vector_store %arg4[%c0_7, %c0_8], %17 {strides = array<i32>} : memref<20x128xf32, #tpu.memory_space<vmem>>, vector<20x128xf32>,
    return
  }
  func.func @transform_0(%arg0: i32) -> (i32, i32) {
    %c0_i32 = arith.constant 0 : i32
    %c0_i32_0 = arith.constant 0 : i32
    return %arg0, %c0_i32 : i32, i32
  }
  func.func @transform_1(%arg0: i32) -> (i32, i32) {
    %c0_i32 = arith.constant 0 : i32
    %c0_i32_0 = arith.constant 0 : i32
    %c0_i32_1 = arith.constant 0 : i32
    return %c0_i32, %c0_i32_0 : i32, i32
  }
  func.func @transform_2(%arg0: i32) -> (i32, i32) {
    %c0_i32 = arith.constant 0 : i32
    %c0_i32_0 = arith.constant 0 : i32
    %c0_i32_1 = arith.constant 0 : i32
    return %c0_i32, %c0_i32_0 : i32, i32
  }
  func.func @transform_3(%arg0: i32) -> (i32, i32) {
    %c0_i32 = arith.constant 0 : i32
    %c0_i32_0 = arith.constant 0 : i32
    return %arg0, %c0_i32 : i32, i32
  }
}

</mosaic_0001>

<bundles_post_ra>
// kernel: tpu_custom_call.1
= control target key start
LH: loop header
LB: loop body
LE: loop exit
PB: predicated region body
PF: predicated region fallthrough
CT: control target
= control target key end

     0   :  { %8 = vsyncpa [#allocation3], 0  ;;  %s443_s0 = inlined_call_operand.hbm [shape: f32[20,128], index: 0, kind: input, shape index: {}]   ;;  %s444_s1 = inlined_call_operand.hbm [shape: f32[128,256], index: 1, kind: input, shape index: {}]   ;;  %s445_s2 = inlined_call_operand.vmem [shape: f32[1,256], index: 2, kind: input, shape index: {}]   ;;  %s446_s3 = inlined_call_operand.hbm [shape: f32[20,128], index: 3, kind: output, shape index: {}]  }
   0x1   :  { %9 = vsyncpa [#allocation6], 0 }
   0x2   :  { %10 = vsyncpa [#allocation4], 0  ;;  %s367_s12 = smov [#allocation2]   ;;  %s295_s16 = scalar_lea.hbm %s443_s0, 384 }
   0x3   :  { %s16_s13 = sshll.u32 %s367_s12, 4  ;;  %p296_p0 = scmp.ne.s32.totalorder %s443_s0, %s295_s16  ;;  %s17_s13 = int_to_ptr.vmem [resolvable:$true] %s16_s13 }
   0x4   :  { %p299_p1 = scmp.lt.u32.totalorder %s295_s16, %s443_s0 }
   0x6   :  { %p301_p2 = pnand %p299_p1, %p296_p0 }
   0x8   :  { %304 = shalt.err (!%p301_p2)
}
   0x9   :  { %s305_s21 = scalar_lea.vmem %s17_s13, 384  ;;  %p310_p4 = scmp.lt.s32.totalorder %s17_s13, %s17_s13 }
   0xa   :  { %p306_p3 = scmp.ne.s32.totalorder %s17_s13, %s305_s21  ;;  %p311_p5 = scmp.lt.s32.totalorder %s305_s21, %s305_s21 }
   0xc   :  { %p312_p6 = por %p311_p5, %p310_p4 }
   0xe   :  { %p313_p7 = pnand %p312_p6, %p306_p3 }
  0x10   :  { %316 = shalt.err (!%p313_p7)
}
  0x11   :  { %s368_s22 = smov 128   ;;  %s369_s23 = smov 8  }
  0x12   :  { %22 = dma.hbm_to_vmem [thread:$0]  %s443_s0, 384, %s17_s13, [#allocation3], %s368_s22, %s368_s22, %s369_s23  }
  0x13   :  { %s370_s26 = smov [#allocation5]   ;;  %s317_s30 = scalar_lea.hbm %s444_s1, 4096 }
  0x14   :  { %s28_s27 = sshll.u32 %s370_s26, 4  ;;  %p318_p8 = scmp.ne.s32.totalorder %s444_s1, %s317_s30  ;;  %s29_s27 = int_to_ptr.vmem [resolvable:$true] %s28_s27 }
  0x15   :  { %p321_p9 = scmp.lt.u32.totalorder %s317_s30, %s444_s1 }
  0x17   :  { %p323_p10 = pnand %p321_p9, %p318_p8 }
  0x19   :  { %326 = shalt.err (!%p323_p10)
}
  0x1a   :  { %s327_s8 = scalar_lea.vmem %s29_s27, 4096  ;;  %p332_p12 = scmp.lt.s32.totalorder %s29_s27, %s29_s27 }
  0x1b   :  { %p328_p11 = scmp.ne.s32.totalorder %s29_s27, %s327_s8  ;;  %p333_p13 = scmp.lt.s32.totalorder %s327_s8, %s327_s8 }
  0x1d   :  { %p334_p0 = por %p333_p13, %p332_p12 }
  0x1f   :  { %p335_p1 = pnand %p334_p0, %p328_p11 }
  0x21   :  { %338 = shalt.err (!%p335_p1)
}
  0x22   :  { %s371_s0 = smov 256   ;;  %s372_s9 = smov 16  }
  0x23   :  { %34 = dma.hbm_to_vmem [thread:$0]  %s444_s1, 4096, %s29_s27, [#allocation6], %s371_s0, %s371_s0, %s372_s9  }
  0x24   :  { %361 = dma.done.wait [#allocation3], 384  }
  0x25   :  { %362 = vsyncadd [#allocation3], 4294966912 }
  0x26   :  { %363 = dma.done.wait [#allocation6], 4096  }
  0x27   :  { %364 = vsyncadd [#allocation6], 4294963200  ;;  %v373_v0 = vmov 0.0   ;;  %v47_v1 = vld [vmem:[#allocation5 + $0x8] sm:$0xff]  ;;  %v49_v2 = vld [vmem:[#allocation5 + $0x18] sm:$0xff]  ;;  %v80_v52 = vlaneseq }
  0x28   :  { %154 = vmatprep.mubr.f32.mxu0 %v373_v0  ;;  %160 = vmatprep.mubr.f32.mxu1 %v373_v0  ;;  %v46_v3 = vld [vmem:[#allocation5] sm:$0xff]  ;;  %v227_v4 = vpack.c.bf16 %v49_v2, %v47_v1  ;;  %v48_v5 = vld [vmem:[#allocation5 + $0x10] sm:$0xff]  ;;  %v51_v6 = vld [vmem:[#allocation5 + $0x28] sm:$0xff] }
  0x29   :  { %v53_v7 = vld [vmem:[#allocation5 + $0x38] sm:$0xff]  ;;  %v229_v8 = vpack.c.bf16 %v48_v5, %v46_v3  ;;  %v50_v10 = vld [vmem:[#allocation5 + $0x20] sm:$0xff]  ;;  %v52_v11 = vld [vmem:[#allocation5 + $0x30] sm:$0xff]  ;;  %v81_v53 = vshrl.u32 %v80_v52, 7 }
  0x2a   :  { %v231_v9 = vpack.c.bf16 %v53_v7, %v51_v6  ;;  %v55_v12 = vld [vmem:[#allocation5 + $0x48] sm:$0xff]  ;;  %228 = vmatprep.subr.bf16.mxu0 %v227_v4  ;;  %259 = vmatprep.subr.bf16.mxu1 %v227_v4  ;;  %v57_v13 = vld [vmem:[#allocation5 + $0x58] sm:$0xff]  ;;  %v233_v14 = vpack.c.bf16 %v52_v11, %v50_v10  ;;  %v54_v16 = vld [vmem:[#allocation5 + $0x40] sm:$0xff] }
  0x2b   :  { %230 = vmatpush1.bf16.msra.mxu0 %v229_v8  ;;  %267 = vmatpush1.bf16.msra.mxu1 %v229_v8  ;;  %v235_v15 = vpack.c.bf16 %v57_v13, %v55_v12  ;;  %v56_v17 = vld [vmem:[#allocation5 + $0x50] sm:$0xff]  ;;  %v59_v18 = vld [vmem:[#allocation5 + $0x68] sm:$0xff]  ;;  %v61_v19 = vld [vmem:[#allocation5 + $0x78] sm:$0xff]  ;;  %v86_v54 = vsub.s32 1, %v81_v53  ;;  %v82_v5 = vsub.s32 0, %v81_v53 }
  0x2c   :  { %232 = vmatprep.subr.bf16.mxu0 %v231_v9  ;;  %260 = vmatprep.subr.bf16.mxu1 %v231_v9  ;;  %v237_v20 = vpack.c.bf16 %v56_v17, %v54_v16  ;;  %v239_v21 = vpack.c.bf16 %v61_v19, %v59_v18  ;;  %v58_v22 = vld [vmem:[#allocation5 + $0x60] sm:$0xff]  ;;  %v60_v23 = vld [vmem:[#allocation5 + $0x70] sm:$0xff]  ;;  %v63_v24 = vld [vmem:[#allocation5 + $0x88] sm:$0xff] }
  0x2d   :  { %v65_v25 = vld [vmem:[#allocation5 + $0x98] sm:$0xff]  ;;  %v241_v26 = vpack.c.bf16 %v60_v23, %v58_v22  ;;  %v62_v28 = vld [vmem:[#allocation5 + $0x80] sm:$0xff]  ;;  %v64_v29 = vld [vmem:[#allocation5 + $0x90] sm:$0xff] }
  0x2e   :  { %v243_v27 = vpack.c.bf16 %v65_v25, %v63_v24  ;;  %v67_v30 = vld [vmem:[#allocation5 + $0xa8] sm:$0xff]  ;;  %v69_v31 = vld [vmem:[#allocation5 + $0xb8] sm:$0xff]  ;;  %v245_v32 = vpack.c.bf16 %v64_v29, %v62_v28  ;;  %v66_v34 = vld [vmem:[#allocation5 + $0xa0] sm:$0xff] }
  0x2f   :  { %234 = vmatpush1.bf16.msra.mxu0 %v233_v14  ;;  %268 = vmatpush1.bf16.msra.mxu1 %v233_v14  ;;  %v247_v33 = vpack.c.bf16 %v69_v31, %v67_v30  ;;  %v68_v35 = vld [vmem:[#allocation5 + $0xb0] sm:$0xff]  ;;  %v71_v36 = vld [vmem:[#allocation5 + $0xc8] sm:$0xff]  ;;  %v73_v37 = vld [vmem:[#allocation5 + $0xd8] sm:$0xff] }
  0x30   :  { %236 = vmatprep.subr.bf16.mxu0 %v235_v15  ;;  %261 = vmatprep.subr.bf16.mxu1 %v235_v15  ;;  %v249_v38 = vpack.c.bf16 %v68_v35, %v66_v34  ;;  %v251_v39 = vpack.c.bf16 %v73_v37, %v71_v36  ;;  %v70_v40 = vld [vmem:[#allocation5 + $0xc0] sm:$0xff]  ;;  %v72_v41 = vld [vmem:[#allocation5 + $0xd0] sm:$0xff]  ;;  %v75_v42 = vld [vmem:[#allocation5 + $0xe8] sm:$0xff] }
  0x31   :  { %v77_v43 = vld [vmem:[#allocation5 + $0xf8] sm:$0xff]  ;;  %v253_v44 = vpack.c.bf16 %v72_v41, %v70_v40  ;;  %v74_v46 = vld [vmem:[#allocation5 + $0xe0] sm:$0xff]  ;;  %v76_v47 = vld [vmem:[#allocation5 + $0xf0] sm:$0xff] }
  0x32   :  { %v255_v45 = vpack.c.bf16 %v77_v43, %v75_v42  ;;  %v257_v48 = vpack.c.bf16 %v76_v47, %v74_v46  ;;  %v43_v49 = vld [vmem:[#allocation2] sm:$0xff]  ;;  %v44_v50 = vld [vmem:[#allocation2 + $0x8] sm:$0xff]  ;;  %v45_v51 = vld [vmem:[#allocation2 + $0x10] sm:$0xf] }
  0x33   :  { %238 = vmatpush1.bf16.msra.mxu0 %v237_v20  ;;  %269 = vmatpush1.bf16.msra.mxu1 %v237_v20  ;;  %v78_v55 = vld [vmem:[%s445_s2] sm:$0x3]  ;;  %s374_s2 = smov [#allocation7]  }
  0x34   :  { %240 = vmatprep.subr.bf16.mxu0 %v239_v21  ;;  %262 = vmatprep.subr.bf16.mxu1 %v239_v21  ;;  %v87_v56 = vrot.slane %v78_v55, %v86_v54  ;;  %v83_v8 = vrot.slane %v78_v55, %v82_v5  ;;  %s211_s13 = sshll.u32 %s374_s2, 4  ;;  %s212_s13 = int_to_ptr.vmem [resolvable:$true] %s211_s13 }
  0x35   :  { %s339_s14 = scalar_lea.vmem %s212_s13, 384  ;;  %p344_p3 = scmp.lt.s32.totalorder %s212_s13, %s212_s13 }
  0x36   :  { %p340_p2 = scmp.ne.s32.totalorder %s212_s13, %s339_s14  ;;  %p345_p4 = scmp.lt.s32.totalorder %s339_s14, %s339_s14 }
  0x37   :  { %242 = vmatpush1.bf16.msra.mxu0 %v241_v26  ;;  %270 = vmatpush1.bf16.msra.mxu1 %v241_v26 }
  0x38   :  { %244 = vmatprep.subr.bf16.mxu0 %v243_v27  ;;  %263 = vmatprep.subr.bf16.mxu1 %v243_v27  ;;  %p346_p5 = por %p345_p4, %p344_p3 }
  0x3a   :  { %p347_p6 = pnand %p346_p5, %p340_p2 }
  0x3b   :  { %246 = vmatpush1.bf16.msra.mxu0 %v245_v32  ;;  %271 = vmatpush1.bf16.msra.mxu1 %v245_v32 }
  0x3c   :  { %248 = vmatprep.subr.bf16.mxu0 %v247_v33  ;;  %264 = vmatprep.subr.bf16.mxu1 %v247_v33 }
  0x3f   :  { %250 = vmatpush1.bf16.msra.mxu0 %v249_v38  ;;  %272 = vmatpush1.bf16.msra.mxu1 %v249_v38 }
  0x40   :  { %252 = vmatprep.subr.bf16.mxu0 %v251_v39  ;;  %265 = vmatprep.subr.bf16.mxu1 %v251_v39 }
  0x43   :  { %254 = vmatpush1.bf16.msra.mxu0 %v253_v44  ;;  %273 = vmatpush1.bf16.msra.mxu1 %v253_v44 }
  0x44   :  { %256 = vmatprep.subr.bf16.mxu0 %v255_v45  ;;  %266 = vmatprep.subr.bf16.mxu1 %v255_v45 }
  0x47   :  { %258 = vmatpush1.bf16.msra.mxu0 %v257_v48  ;;  %274 = vmatpush1.bf16.msra.mxu1 %v257_v48 }
  0x4a   :  { %155 = vmatmul.mubr.f32.vlgmr.msra.gmra.mrb[0].mxu0 %v43_v49  ;;  %161 = vmatmul.mubr.f32.vlgmr.msra.gmra.mrb[0].mxu1 %v44_v50 }
  0x4b   :  { %166 = vmatprep.mubr.f32.mxu1 %v373_v0 }
  0x4e   :  { %167 = vmatmul.mubr.f32.gmra.mrb[2].mxu1 %v45_v51 }
 0x11d   :  { %v156_v57 = vpop.f32.mrb[0].mxu0  ;;  %v162_v58 = vpop.f32.mrb[0].mxu1 }
 0x11e   :  { %v158_v59 = vpop.f32.mrb[1].mxu0  ;;  %v164_v60 = vpop.f32.mrb[1].mxu1  ;;  %v157_v12 = vadd.f32 %v156_v57, %v83_v8  ;;  %v163_v13 = vadd.f32 %v162_v58, %v83_v8 }
 0x11f   :  { %v159_v61 = vadd.f32 %v158_v59, %v87_v56  ;;  %v165_v62 = vadd.f32 %v164_v60, %v87_v56 }
 0x120   :  { %v173_v15 = vmax.f32 %v157_v12, 0.0  ;;  %v174_v17 = vmax.f32 %v163_v13, 0.0 }
 0x121   :  { %v224_v63 = vmul.f32 -1.442695, %v159_v61  ;;  %v225_v1 = vmul.f32 -1.442695, %v165_v62  ;;  %v168_v2 = vpop.f32.mrb[2].mxu1 }
 0x122   :  { %v170_v0 = vpop.f32.mrb[3].mxu1  ;;  %v169_v16 = vadd.f32 %v168_v2, %v83_v8  ;;  %v194_v18 = vsub.f32 %v173_v15, %v43_v49  ;;  %v195_v21 = vsub.f32 %v174_v17, %v44_v50 }
 0x123   :  { %283 = vpow2.f32 %v224_v63  ;;  %v171_v3 = vadd.f32 %v170_v0, %v87_v56 }
 0x124   :  { %285 = vpow2.f32 %v225_v1  ;;  %v175_v19 = vmax.f32 %v169_v16, 0.0 }
 0x125   :  { %v226_v4 = vmul.f32 -1.442695, %v171_v3 }
 0x126   :  { %v196_v25 = vsub.f32 %v175_v19, %v45_v51 }
 0x127   :  { %287 = vpow2.f32 %v226_v4 }
 0x12d   :  { %v284_v6 = vpop.eup %283 }
 0x12e   :  { %v286_v7 = vpop.eup %285  ;;  %v185_v9 = vadd.f32 1.0, %v284_v6 }
 0x12f   :  { %v186_v10 = vadd.f32 1.0, %v286_v7 }
 0x130   :  { %289 = vrcp.f32 %v185_v9 }
 0x131   :  { %v288_v11 = vpop.eup %287  ;;  %291 = vrcp.f32 %v186_v10 }
 0x132   :  { %v187_v14 = vadd.f32 1.0, %v288_v11 }
 0x134   :  { %293 = vrcp.f32 %v187_v14 }
 0x13a   :  { %v290_v20 = vpop.eup %289 }
 0x13b   :  { %v292_v22 = vpop.eup %291  ;;  %v197_v23 = vmul.f32 %v290_v20, %v194_v18 }
 0x13c   :  { %v198_v24 = vmul.f32 %v292_v22, %v195_v21 }
 0x13d   :  { %v200_v26 = vadd.f32 %v197_v23, %v43_v49 }
 0x13e   :  { %v294_v27 = vpop.eup %293  ;;  %v201_v28 = vadd.f32 %v198_v24, %v44_v50 }
 0x13f   :  { %v199_v29 = vmul.f32 %v294_v27, %v196_v25  ;;  %203 = vst [vmem:[#allocation7] sm:$0xff] %v200_v26 }
 0x140   :  { %204 = vst [vmem:[#allocation7 + $0x8] sm:$0xff] %v201_v28 }
 0x141   :  { %v202_v30 = vadd.f32 %v199_v29, %v45_v51 }
 0x143   :  { %205 = vst [vmem:[#allocation7 + $0x10] sm:$0xf] %v202_v30 }
 0x144   :  { %350 = shalt.err (!%p347_p6)
}
 0x145   :  { %s351_s17 = scalar_lea.hbm %s446_s3, 384 }
 0x146   :  { %p352_p7 = scmp.ne.s32.totalorder %s446_s3, %s351_s17  ;;  %p355_p8 = scmp.lt.u32.totalorder %s351_s17, %s446_s3 }
 0x148   :  { %p357_p9 = pnand %p355_p8, %p352_p7 }
 0x14a   :  { %360 = shalt.err (!%p357_p9)
}
 0x14b   :  { %217 = dma.vmem_to_hbm [thread:$0]  %s212_s13, 384, %s446_s3, [#allocation4], %s368_s22, %s368_s22, %s369_s23  }
 0x14c   :  { %365 = dma.done.wait [#allocation4], 384  }
 0x14d   :  { %366 = vsyncadd [#allocation4], 4294966912 }
 0x14e   :  { %221 = vsyncpa [#allocation3], 1 }
 0x14f   :  { %222 = vsyncpa [#allocation6], 1 }
 0x150   :  { %223 = vsyncpa [#allocation4], 1 }

</bundles_post_ra>
